<compile_context>
chip_gen: v6e
topology: v6e:2x2x1
jax: 0.10.0
libtpu: 0.0.40
codegen_flags: <defaults>
</compile_context>

<pallas_src>
import functools
import math

import jax
import jax.numpy as jnp
from jax.experimental import pallas as pl
from jax.experimental.pallas import tpu as pltpu

_SHIFT = math.log(2.0)                      # == torch.log(torch.tensor(2.0)).item()
_LANE = 128
_MIB = 1024 * 1024
_WIDTH_CANDIDATES = (2048, 1024, 512, 256, 128)
_RAGGED_SINGLE_BLOCK_MAX = 32 * 1024        # ragged inputs up to this size -> one block


def _shifted_softplus_kernel(x_ref, o_ref):
    # Stable softplus: max(x, 0) + log1p(exp(-|x|)). exp/log1p go to the EUP
    # slot, max/abs/add to the VPU — neither is close to the HBM bottleneck.
    # TODO(synk): on v7x, bf16 inputs could keep exp/log1p in bf16 (EUP is the
    # only near-co-binding unit there); kept in f32 for exact parity with the
    # PyTorch reference on all generations.
    x = x_ref[...].astype(jnp.float32)
    sp = jnp.maximum(x, 0.0) + jnp.log1p(jnp.exp(-jnp.abs(x)))
    o_ref[...] = (sp - _SHIFT).astype(o_ref.dtype)


def _sublane(dtype) -> int:
    # Native packing tile: (8,128) f32, (16,128) bf16/f16, (32,128) int8/fp8.
    return {4: 8, 2: 16, 1: 32}.get(jnp.dtype(dtype).itemsize, 8)


@functools.lru_cache(maxsize=None)
def _chip_profile():
    """Returns (target_block_bytes, vmem_limit_bytes_or_None) for this TPU gen."""
    kind = ""
    try:
        kind = jax.devices()[0].device_kind.lower()
    except Exception:
        pass
    vmem_cap = None
    try:
        vmem_cap = int(getattr(pltpu.get_tpu_info(), "vmem_capacity_bytes", 0)) or None
    except Exception:
        pass

    if any(t in kind for t in ("v2", "v3", "v4", "v5")):
        # v5e & older: 16 MiB scoped-VMEM default; ~3 MiB blocks keep the
        # double-buffered in+out (4x block) comfortably under it.
        block, limit = 3 * _MIB, None
    else:
        # v6e / v7x (and unknown/future chips): faster HBM -> amortize the
        # per-grid-step overhead with ~8 MiB blocks; raise the scoped-VMEM
        # limit to 4x block + headroom.
        block, limit = 8 * _MIB, 40 * _MIB

    if vmem_cap is not None:
        # Never let 4x block (+ compiler scratch) approach physical VMEM —
        # v7x has only 64 MiB per TensorCore (vs 128 MiB on v5e/v6e).
        block = max(_MIB, min(block, (vmem_cap - 16 * _MIB) // 6))
        if limit is not None:
            limit = min(4 * block + 8 * _MIB, vmem_cap - 16 * _MIB)
    return block, limit


def _pick_width(n: int) -> int:
    divisors = [c for c in _WIDTH_CANDIDATES if n % c == 0]
    wide = [c for c in divisors if n // c >= 8]
    return wide[0] if wide else divisors[0]


def _run_2d(x2d: jax.Array) -> jax.Array:
    rows, width = x2d.shape
    itemsize = jnp.dtype(x2d.dtype).itemsize
    sub = _sublane(x2d.dtype)
    target_block_bytes, vmem_limit = _chip_profile()

    if rows <= sub:
        block_rows = rows                                   # block == full dim (legal)
    else:
        # Rows per block from the per-generation byte budget...
        by_bytes = max(sub, (target_block_bytes // (width * itemsize)) // sub * sub)
        # ...capped so the grid has >= min(8, ceil(rows/sub)) steps: keeps
        # DMA/compute overlapped and gives both v7x TCs several blocks each.
        steps = min(8, pl.cdiv(rows, sub))
        by_steps = pl.cdiv(pl.cdiv(rows, steps), sub) * sub
        block_rows = max(sub, min(by_bytes, by_steps))

    grid = (pl.cdiv(rows, block_rows),)                     # trailing partial block masked

    n = rows * width
    cost = pl.CostEstimate(flops=5 * n, transcendentals=2 * n,
                           bytes_accessed=2 * n * itemsize)

    return pl.pallas_call(
        _shifted_softplus_kernel,
        out_shape=jax.ShapeDtypeStruct((rows, width), x2d.dtype),
        grid_spec=pltpu.PrefetchScalarGridSpec(
            num_scalar_prefetch=0,
            grid=grid,
            in_specs=[pl.BlockSpec((block_rows, width), lambda i: (i, 0))],
            out_specs=pl.BlockSpec((block_rows, width), lambda i: (i, 0)),
        ),
        compiler_params=pltpu.CompilerParams(
            dimension_semantics=("parallel",),
            vmem_limit_bytes=vmem_limit),
        cost_estimate=cost,
    )(x2d)


def shifted_softplus(x: jax.Array) -> jax.Array:
    """ShiftedSoftplus forward: softplus(x) - log(2). f32 / bf16 / f16, any shape."""
    orig_shape = x.shape
    n = x.size
    if n == 0:
        return x
    if jnp.dtype(x.dtype).itemsize > 4:
        # float64 etc. are not supported by Mosaic — plain-XLA fallback.
        return (jnp.logaddexp(0.0, x.astype(jnp.float32)) - _SHIFT).astype(x.dtype)

    if n % _LANE == 0:
        # Fast path: free reshape into a lane-dense slab — 1 HBM read + 1 write.
        width = _pick_width(n)
        return _run_2d(x.reshape(n // width, width)).reshape(orig_shape)

    # Ragged element count (rare for NN activations).
    x_flat = x.reshape(-1)
    if n <= _RAGGED_SINGLE_BLOCK_MAX:
        # Whole array as ONE full-extent (1, n) block: no pad, no slice.
        return _run_2d(x_flat.reshape(1, n)).reshape(orig_shape)

    # Large ragged: aligned prefix through the fast path; the <128-element tail
    # as its own tiny full-extent block; single concatenate (tail negligible).
    n_aligned = n - (n % _LANE)
    width = _pick_width(n_aligned)
    head = _run_2d(x_flat[:n_aligned].reshape(n_aligned // width, width)).reshape(-1)
    tail = _run_2d(x_flat[n_aligned:].reshape(1, n % _LANE)).reshape(-1)
    return jnp.concatenate([head, tail]).reshape(orig_shape)


if __name__ == "__main__":
    key = jax.random.PRNGKey(0)
    k1, k2, k3, k4 = jax.random.split(key, 4)

    # Primary: NCHW-like activation (fast path, single block).
    x1 = jax.random.normal(k1, (2, 4, 16, 16), dtype=jnp.float32) * 5.0
    # SchNet-like (num_atoms, hidden) activation exercising a masked partial block.
    x2 = jax.random.normal(k2, (17, 128), dtype=jnp.float32) * 5.0
    # Ragged element count (single full-extent (1, n) block, no pad/slice).
    x3 = jax.random.normal(k3, (3, 5, 7), dtype=jnp.float32) * 5.0
    # bf16 input (dtype-aware sublane packing).
    x4 = (jax.random.normal(k4, (4, 64, 128), dtype=jnp.float32) * 5.0).astype(jnp.bfloat16)

    for x, tol in ((x1, 1e-5), (x2, 1e-5), (x3, 1e-5), (x4, 2e-2)):
        y = shifted_softplus(x)
        jax.block_until_ready(y)
        assert y.shape == x.shape and y.dtype == x.dtype
        ref = jnp.logaddexp(0.0, x.astype(jnp.float32)) - math.log(2.0)
        assert jnp.allclose(y.astype(jnp.float32), ref, atol=tol, rtol=tol), (x.shape, x.dtype)

    print("KERNEL_OK")
</pallas_src>

<mosaic_0001>
module attributes {stable_mosaic.version = 11 : i64} {
  func.func @_shifted_softplus_kernel(%arg0: i32, %arg1: memref<8x256xf32, #tpu.memory_space<vmem>>, %arg2: memref<8x256xf32, #tpu.memory_space<vmem>>) attributes {dimension_semantics = [#tpu.dimension_semantics<parallel>], iteration_bounds = array<i64: 1>, scalar_prefetch = 0 : i64, scratch_operands = 0 : i64, tpu.core_type = #tpu.core_type<tc>, window_params = [{transform_indices = @transform_0, window_bounds = array<i64: 8, 256>}, {transform_indices = @transform_1, window_bounds = array<i64: 8, 256>}]} {
    %c0 = arith.constant 0 : index
    %c0_0 = arith.constant 0 : index
    %0 = vector.load %arg1[%c0, %c0_0] : memref<8x256xf32, #tpu.memory_space<vmem>>, vector<8x256xf32>
    %cst = arith.constant 0.000000e+00 : f32
    %1 = vector.broadcast %cst : f32 to vector<8x256xf32>
    %2 = arith.maximumf %0, %1 : vector<8x256xf32>
    %3 = math.absf %0 : vector<8x256xf32>
    %cst_1 = arith.constant 0.000000e+00 : f32
    %4 = vector.broadcast %cst_1 : f32 to vector<8x256xf32>
    %5 = arith.subf %4, %3 : vector<8x256xf32>
    %6 = math.exp %5 : vector<8x256xf32>
    %7 = math.log1p %6 : vector<8x256xf32>
    %8 = arith.addf %2, %7 : vector<8x256xf32>
    %cst_2 = arith.constant 0.693147182 : f32
    %9 = vector.broadcast %cst_2 : f32 to vector<8x256xf32>
    %10 = arith.subf %8, %9 : vector<8x256xf32>
    %c0_3 = arith.constant 0 : index
    %c0_4 = arith.constant 0 : index
    %11 = vector.load %arg2[%c0_3, %c0_4] : memref<8x256xf32, #tpu.memory_space<vmem>>, vector<8x256xf32>
    tpu.vector_store %arg2[%c0_3, %c0_4], %10 {strides = array<i32>} : memref<8x256xf32, #tpu.memory_space<vmem>>, vector<8x256xf32>,
    return
  }
  func.func @transform_0(%arg0: i32) -> (i32, i32) {
    %c0_i32 = arith.constant 0 : i32
    %c0_i32_0 = arith.constant 0 : i32
    return %arg0, %c0_i32 : i32, i32
  }
  func.func @transform_1(%arg0: i32) -> (i32, i32) {
    %c0_i32 = arith.constant 0 : i32
    %c0_i32_0 = arith.constant 0 : i32
    return %arg0, %c0_i32 : i32, i32
  }
}

</mosaic_0001>

<bundles_post_ra>
// kernel: tpu_custom_call.1
= control target key start
LH: loop header
LB: loop body
LE: loop exit
PB: predicated region body
PF: predicated region fallthrough
CT: control target
= control target key end

     0   :  { %6 = vsyncpa [#allocation3], 0  ;;  %s146_s0 = inlined_call_operand.hbm [shape: f32[8,256], index: 0, kind: input, shape index: {}]   ;;  %s147_s1 = inlined_call_operand.hbm [shape: f32[8,256], index: 1, kind: output, shape index: {}]  }
   0x1   :  { %7 = vsyncpa [#allocation4], 0  ;;  %s128_s6 = smov [#allocation2]  }
   0x2   :  { %s14_s7 = sshll.u32 %s128_s6, 4  ;;  %s15_s7 = int_to_ptr.vmem [resolvable:$true] %s14_s7 }
   0x3   :  { %s92_s8 = scalar_lea.vmem %s15_s7, 256  ;;  %p97_p1 = scmp.lt.s32.totalorder %s15_s7, %s15_s7 }
   0x4   :  { %p93_p0 = scmp.ne.s32.totalorder %s15_s7, %s92_s8  ;;  %p98_p2 = scmp.lt.s32.totalorder %s92_s8, %s92_s8 }
   0x6   :  { %p99_p3 = por %p98_p2, %p97_p1 }
   0x8   :  { %p100_p4 = pnand %p99_p3, %p93_p0 }
   0xa   :  { %103 = shalt.err (!%p100_p4)
}
   0xb   :  { %17 = dma.hbm_to_vmem [thread:$0]  %s146_s0, 256, %s15_s7, [#allocation3]  }
   0xc   :  { %124 = dma.done.wait [#allocation3], 256  }
   0xd   :  { %125 = vsyncadd [#allocation3], 4294967040  ;;  %v21_v0 = vld [vmem:[#allocation2] sm:$0xff]  ;;  %v22_v1 = vld [vmem:[#allocation2 + $0x8] sm:$0xff]  ;;  %s129_s0 = smov [#allocation5]  }
   0xe   :  { %v25_v2 = vand.u32 2147483647, %v21_v0  ;;  %v26_v3 = vand.u32 2147483647, %v22_v1  ;;  %v23_v20 = vmax.f32 %v21_v0, 0.0  ;;  %v24_v24 = vmax.f32 %v22_v1, 0.0 }
   0xf   :  { %s63_s11 = sshll.u32 %s129_s0, 4  ;;  %s64_s11 = int_to_ptr.vmem [resolvable:$true] %s63_s11 }
  0x10   :  { %v27_v4 = vsub.f32 0.0, %v25_v2  ;;  %v28_v5 = vsub.f32 0.0, %v26_v3  ;;  %s104_s12 = scalar_lea.vmem %s64_s11, 256  ;;  %p109_p6 = scmp.lt.s32.totalorder %s64_s11, %s64_s11 }
  0x11   :  { %p105_p5 = scmp.ne.s32.totalorder %s64_s11, %s104_s12  ;;  %p110_p7 = scmp.lt.s32.totalorder %s104_s12, %s104_s12 }
  0x12   :  { %v29_v6 = vmul.f32 1.442695, %v27_v4  ;;  %v31_v7 = vmul.f32 1.442695, %v28_v5 }
  0x13   :  { %p111_p8 = por %p110_p7, %p109_p6 }
  0x14   :  { %76 = vpow2.f32 %v29_v6 }
  0x15   :  { %78 = vpow2.f32 %v31_v7  ;;  %p112_p9 = pnand %p111_p8, %p105_p5 }
  0x21   :  { %v77_v8 = vpop.eup %76 }
  0x22   :  { %v79_v9 = vpop.eup %78  ;;  %v33_v10 = vadd.f32 1.0, %v77_v8  ;;  %v36_v12 = vmul.f32 -0.5, %v77_v8  ;;  %v39_v15 = vand.u32 2147483647, %v77_v8 }
  0x23   :  { %v42_v11 = vadd.f32 1.0, %v79_v9  ;;  %v45_v13 = vmul.f32 -0.5, %v79_v9  ;;  %v48_v17 = vand.u32 2147483647, %v79_v9 }
  0x24   :  { %80 = vlog2.f32 %v33_v10  ;;  %v37_v14 = vadd.f32 1.0, %v36_v12  ;;  %vm40_vm0 = vcmp.lt.f32.partialorder %v39_v15, 0.0004427343 }
  0x25   :  { %82 = vlog2.f32 %v42_v11  ;;  %v46_v16 = vadd.f32 1.0, %v45_v13  ;;  %vm49_vm1 = vcmp.lt.f32.partialorder %v48_v17, 0.0004427343 }
  0x26   :  { %v38_v18 = vmul.f32 %v77_v8, %v37_v14 }
  0x27   :  { %v47_v21 = vmul.f32 %v79_v9, %v46_v16 }
  0x31   :  { %v81_v19 = vpop.eup %80 }
  0x32   :  { %v83_v22 = vpop.eup %82  ;;  %v35_v23 = vmul.f32 0.6931472, %v81_v19 }
  0x33   :  { %v44_v25 = vmul.f32 0.6931472, %v83_v22 }
  0x34   :  { %v41_v26 = vsel %vm40_vm0, %v38_v18, %v35_v23 }
  0x35   :  { %v51_v27 = vadd.f32 %v41_v26, %v23_v20  ;;  %v50_v28 = vsel %vm49_vm1, %v47_v21, %v44_v25 }
  0x36   :  { %v52_v29 = vadd.f32 %v50_v28, %v24_v24 }
  0x37   :  { %v72_v30 = vadd.f32 -0.6931472, %v51_v27 }
  0x38   :  { %v73_v31 = vadd.f32 -0.6931472, %v52_v29 }
  0x39   :  { %55 = vst [vmem:[#allocation5] sm:$0xff] %v72_v30 }
  0x3a   :  { %56 = vst [vmem:[#allocation5 + $0x8] sm:$0xff] %v73_v31 }
  0x3b   :  { %115 = shalt.err (!%p112_p9)
}
  0x3c   :  { %66 = dma.vmem_to_hbm [thread:$0]  %s64_s11, 256, %s147_s1, [#allocation4]  }
  0x3d   :  { %126 = dma.done.wait [#allocation4], 256  }
  0x3e   :  { %127 = vsyncadd [#allocation4], 4294967040 }
  0x3f   :  { %70 = vsyncpa [#allocation3], 1 }
  0x40   :  { %71 = vsyncpa [#allocation4], 1 }

</bundles_post_ra>
